<compile_context>
chip_gen: v7x
topology: tpu7x:2x2x1
jax: 0.10.0
libtpu: 0.0.40
codegen_flags: <defaults>
</compile_context>

<pallas_src>
import jax
import jax.numpy as jnp
from jax.experimental import pallas as pl
from jax.experimental.pallas import tpu as pltpu

FEAT = 100        # logical in/out features of both Linear layers (kept unpadded in HBM)
HID_PAD = 128     # lane-aligned padded hidden dim (VMEM/weights only; zero HBM cost)
MAX_B_TILE = 1024 # batch tile cap (well under VMEM on v5e/v6e/v7x)


def _toy_model_kernel(x_ref, w1t_ref, b1_ref, w2t_ref, b2_ref, o_ref):
    # x_ref:   (Bt, 100)
    # w1t_ref: (100, 128)  pre-transposed (in, out), out-dim zero-padded to 128
    # b1_ref:  (1, 128)    zero-padded
    # w2t_ref: (128, 100)  pre-transposed (in, out), in-dim zero-padded to 128
    # b2_ref:  (1, 100)
    x = x_ref[...]

    # l1: x @ W1t + b1, then ReLU  -> lane-dense (Bt, 128) intermediate
    h = jnp.dot(x, w1t_ref[...], preferred_element_type=jnp.float32)
    h = jnp.maximum(h + b1_ref[...], 0.0)

    # seq Linear: h @ W2t + b2, then ReLU -> (Bt, 100)
    y = jnp.dot(h, w2t_ref[...], preferred_element_type=jnp.float32)
    y = jnp.maximum(y + b2_ref[...], 0.0)

    o_ref[...] = y


def _round_up(n, m):
    return ((n + m - 1) // m) * m


def _cdiv(a, b):
    return -(-a // b)


@jax.jit
def toy_model_forward(x, w1, b1, w2, b2):
    """x: (B, 100) f32; w?: (100, 100) PyTorch (out,in); b?: (100,).

    Returns (B, 100) f32 = relu(relu(x @ w1.T + b1) @ w2.T + b2).
    """
    B = x.shape[0]

    # ---- tiny wrapper-side weight prep (no activation copies) ---------------
    pad_h = HID_PAD - FEAT
    w1t = jnp.pad(w1.T, ((0, 0), (0, pad_h)))           # (100, 128)
    w2t = jnp.pad(w2.T, ((0, pad_h), (0, 0)))           # (128, 100)
    b1p = jnp.pad(b1, (0, pad_h)).reshape(1, HID_PAD)   # (1, 128)
    b2p = b2.reshape(1, FEAT)                           # (1, 100)

    # ---- batch tiling: ragged last block, >=2 grid steps when possible ------
    if B <= 8:
        b_tile = B                                   # single block == full batch dim
    else:
        b_tile = min(MAX_B_TILE, max(8, _round_up(_cdiv(B, 2), 8)))
    grid = (_cdiv(B, b_tile),)

    cost = pl.CostEstimate(
        flops=4 * B * FEAT * HID_PAD,                        # 2 matmuls
        transcendentals=0,
        bytes_accessed=(2 * B * FEAT * 4                     # x in + y out
                        + 2 * FEAT * HID_PAD * 4             # weights
                        + (HID_PAD + FEAT) * 4),             # biases
    )

    return pl.pallas_call(
        _toy_model_kernel,
        out_shape=jax.ShapeDtypeStruct((B, FEAT), jnp.float32),
        grid=grid,
        in_specs=[
            pl.BlockSpec((b_tile, FEAT), lambda i: (i, 0)),       # x tile (unpadded)
            pl.BlockSpec((FEAT, HID_PAD), lambda i: (0, 0)),      # W1t (resident)
            pl.BlockSpec((1, HID_PAD), lambda i: (0, 0)),         # b1
            pl.BlockSpec((HID_PAD, FEAT), lambda i: (0, 0)),      # W2t (resident)
            pl.BlockSpec((1, FEAT), lambda i: (0, 0)),            # b2
        ],
        out_specs=pl.BlockSpec((b_tile, FEAT), lambda i: (i, 0)), # y tile (unpadded)
        compiler_params=pltpu.CompilerParams(
            dimension_semantics=("parallel",),
        ),
        cost_estimate=cost,
    )(x, w1t, b1p, w2t, b2p)


def _reference(x, w1, b1, w2, b2):
    h = jnp.maximum(x @ w1.T + b1, 0.0)
    return jnp.maximum(h @ w2.T + b2, 0.0)


if __name__ == "__main__":
    key = jax.random.PRNGKey(0)
    kx, kw1, kb1, kw2, kb2 = jax.random.split(key, 5)

    # Deterministic parameter init (mimics nn.Linear's uniform(-1/sqrt(in), 1/sqrt(in)))
    bound = 1.0 / (FEAT ** 0.5)
    w1 = jax.random.uniform(kw1, (FEAT, FEAT), minval=-bound, maxval=bound, dtype=jnp.float32)
    b1 = jax.random.uniform(kb1, (FEAT,), minval=-bound, maxval=bound, dtype=jnp.float32)
    w2 = jax.random.uniform(kw2, (FEAT, FEAT), minval=-bound, maxval=bound, dtype=jnp.float32)
    b2 = jax.random.uniform(kb2, (FEAT,), minval=-bound, maxval=bound, dtype=jnp.float32)

    # B=8: primary small-shape case (single block).
    # B=3: tiny batch, block == full (non-multiple-of-8) batch dim.
    # B=20: two grid steps (v7x megacore path) with a ragged last block.
    for B in (8, 3, 20):
        xb = jax.random.normal(jax.random.fold_in(kx, B), (B, FEAT), dtype=jnp.float32)
        out = jax.block_until_ready(toy_model_forward(xb, w1, b1, w2, b2))
        ref = _reference(xb, w1, b1, w2, b2)
        assert out.shape == (B, FEAT)
        assert jnp.allclose(out, ref, atol=2e-4, rtol=2e-4), f"mismatch vs reference (B={B})"

    print("KERNEL_OK")
</pallas_src>

<mosaic_0001>
module attributes {stable_mosaic.version = 11 : i64} {
  func.func @_toy_model_kernel(%arg0: i32, %arg1: memref<8x100xf32, #tpu.memory_space<vmem>>, %arg2: memref<100x128xf32, #tpu.memory_space<vmem>>, %arg3: memref<1x128xf32, #tpu.memory_space<vmem>>, %arg4: memref<128x100xf32, #tpu.memory_space<vmem>>, %arg5: memref<1x100xf32, #tpu.memory_space<vmem>>, %arg6: memref<8x100xf32, #tpu.memory_space<vmem>>) attributes {dimension_semantics = [#tpu.dimension_semantics<parallel>], iteration_bounds = array<i64: 1>, scalar_prefetch = 0 : i64, scratch_operands = 0 : i64, tpu.core_type = #tpu.core_type<tc>, window_params = [{transform_indices = @transform_0, window_bounds = array<i64: 8, 100>}, {pipeline_mode = #tpu.pipeline_mode<synchronous>, transform_indices = @transform_1, window_bounds = array<i64: 100, 128>}, {pipeline_mode = #tpu.pipeline_mode<synchronous>, transform_indices = @transform_2, window_bounds = array<i64: 1, 128>}, {pipeline_mode = #tpu.pipeline_mode<synchronous>, transform_indices = @transform_3, window_bounds = array<i64: 128, 100>}, {pipeline_mode = #tpu.pipeline_mode<synchronous>, transform_indices = @transform_4, window_bounds = array<i64: 1, 100>}, {transform_indices = @transform_5, window_bounds = array<i64: 8, 100>}]} {
    %c0 = arith.constant 0 : index
    %c0_0 = arith.constant 0 : index
    %0 = vector.load %arg1[%c0, %c0_0] : memref<8x100xf32, #tpu.memory_space<vmem>>, vector<8x100xf32>
    %c0_1 = arith.constant 0 : index
    %c0_2 = arith.constant 0 : index
    %1 = vector.load %arg2[%c0_1, %c0_2] : memref<100x128xf32, #tpu.memory_space<vmem>>, vector<100x128xf32>
    %cst = arith.constant dense<0.000000e+00> : vector<8x128xf32>
    %2 = tpu.matmul %0, %1, %cst {dimension_numbers = #tpu.dot_dimension_numbers<[1], [0], [0], [1], [0, 0, 1, 1], [], []>} : vector<8x100xf32>, vector<100x128xf32>, vector<8x128xf32> -> vector<8x128xf32>
    %c0_3 = arith.constant 0 : index
    %c0_4 = arith.constant 0 : index
    %3 = vector.load %arg3[%c0_3, %c0_4] : memref<1x128xf32, #tpu.memory_space<vmem>>, vector<1x128xf32>
    %4 = vector.broadcast %3 : vector<1x128xf32> to vector<8x128xf32>
    %5 = arith.addf %2, %4 : vector<8x128xf32>
    %cst_5 = arith.constant 0.000000e+00 : f32
    %6 = vector.broadcast %cst_5 : f32 to vector<8x128xf32>
    %7 = arith.maximumf %5, %6 : vector<8x128xf32>
    %c0_6 = arith.constant 0 : index
    %c0_7 = arith.constant 0 : index
    %8 = vector.load %arg4[%c0_6, %c0_7] : memref<128x100xf32, #tpu.memory_space<vmem>>, vector<128x100xf32>
    %cst_8 = arith.constant dense<0.000000e+00> : vector<8x100xf32>
    %9 = tpu.matmul %7, %8, %cst_8 {dimension_numbers = #tpu.dot_dimension_numbers<[1], [0], [0], [1], [0, 0, 1, 1], [], []>} : vector<8x128xf32>, vector<128x100xf32>, vector<8x100xf32> -> vector<8x100xf32>
    %c0_9 = arith.constant 0 : index
    %c0_10 = arith.constant 0 : index
    %10 = vector.load %arg5[%c0_9, %c0_10] : memref<1x100xf32, #tpu.memory_space<vmem>>, vector<1x100xf32>
    %11 = vector.broadcast %10 : vector<1x100xf32> to vector<8x100xf32>
    %12 = arith.addf %9, %11 : vector<8x100xf32>
    %cst_11 = arith.constant 0.000000e+00 : f32
    %13 = vector.broadcast %cst_11 : f32 to vector<8x100xf32>
    %14 = arith.maximumf %12, %13 : vector<8x100xf32>
    %c0_12 = arith.constant 0 : index
    %c0_13 = arith.constant 0 : index
    %15 = vector.load %arg6[%c0_12, %c0_13] : memref<8x100xf32, #tpu.memory_space<vmem>>, vector<8x100xf32>
    tpu.vector_store %arg6[%c0_12, %c0_13], %14 {strides = array<i32>} : memref<8x100xf32, #tpu.memory_space<vmem>>, vector<8x100xf32>,
    return
  }
  func.func @transform_0(%arg0: i32) -> (i32, i32) {
    %c0_i32 = arith.constant 0 : i32
    %c0_i32_0 = arith.constant 0 : i32
    return %arg0, %c0_i32 : i32, i32
  }
  func.func @transform_1(%arg0: i32) -> (i32, i32) {
    %c0_i32 = arith.constant 0 : i32
    %c0_i32_0 = arith.constant 0 : i32
    %c0_i32_1 = arith.constant 0 : i32
    return %c0_i32, %c0_i32_0 : i32, i32
  }
  func.func @transform_2(%arg0: i32) -> (i32, i32) {
    %c0_i32 = arith.constant 0 : i32
    %c0_i32_0 = arith.constant 0 : i32
    %c0_i32_1 = arith.constant 0 : i32
    return %c0_i32, %c0_i32_0 : i32, i32
  }
  func.func @transform_3(%arg0: i32) -> (i32, i32) {
    %c0_i32 = arith.constant 0 : i32
    %c0_i32_0 = arith.constant 0 : i32
    %c0_i32_1 = arith.constant 0 : i32
    return %c0_i32, %c0_i32_0 : i32, i32
  }
  func.func @transform_4(%arg0: i32) -> (i32, i32) {
    %c0_i32 = arith.constant 0 : i32
    %c0_i32_0 = arith.constant 0 : i32
    %c0_i32_1 = arith.constant 0 : i32
    return %c0_i32, %c0_i32_0 : i32, i32
  }
  func.func @transform_5(%arg0: i32) -> (i32, i32) {
    %c0_i32 = arith.constant 0 : i32
    %c0_i32_0 = arith.constant 0 : i32
    return %arg0, %c0_i32 : i32, i32
  }
}

</mosaic_0001>

<bundles_post_ra>
// kernel: toy_model_forward.1
= control target key start
LH: loop header
LB: loop body
LE: loop exit
PB: predicated region body
PF: predicated region fallthrough
CT: control target
= control target key end

     0   :  { %v399_v3 = vmov 0.0|0.0   ;;  %vm400_vm0 = vmmov 0   ;;  %v401_v6 = vmov 0.0   ;;  %s557_s0 = inlined_call_operand.vmem [shape: f32[8,100], index: 0, kind: input, shape index: {}]   ;;  %s558_s1 = inlined_call_operand.vmem [shape: f32[100,128], index: 1, kind: input, shape index: {}]   ;;  %s559_s2 = inlined_call_operand.vmem [shape: f32[1,128], index: 2, kind: input, shape index: {}]   ;;  %s560_s3 = inlined_call_operand.vmem [shape: f32[128,100], index: 3, kind: input, shape index: {}]   ;;  %s561_s4 = inlined_call_operand.vmem [shape: f32[1,100], index: 4, kind: input, shape index: {}]   ;;  %s562_s5 = inlined_call_operand.hbm [shape: f32[8,100], index: 5, kind: output, shape index: {}]  }
   0x1   :  { %v22_v0 = vld [vmem:[%s558_s1] sm:$0xff]  ;;  %v23_v1 = vld [vmem:[%s558_s1 + $0x8] sm:$0xff]  ;;  %v24_v2 = vld [vmem:[%s558_s1 + $0x10] sm:$0xff]  ;;  %329 = vmatprep.subr.bf16.mxu0 %v399_v3  ;;  %347 = vmatprep.subr.bf16.mxu1 %v399_v3 }
   0x2   :  { %v330_v4 = vpack.c.bf16 %v23_v1, %v22_v0  ;;  %v25_v5 = vld [vmem:[%s558_s1 + $0x18] sm:$0xff]  ;;  %291 = vmatprep.mubr.msk.f32.mxu0 %vm400_vm0, %v401_v6  ;;  %326 = vmatprep.mubr.msk.f32.mxu1 %vm400_vm0, %v401_v6  ;;  %v26_v8 = vld [vmem:[%s558_s1 + $0x20] sm:$0xff]  ;;  %v27_v9 = vld [vmem:[%s558_s1 + $0x28] sm:$0xff] }
   0x3   :  { %v333_v7 = vpack.c.bf16 %v25_v5, %v24_v2  ;;  %v121_v10 = vld [vmem:[%s560_s3] sm:$0xff]  ;;  %v122_v11 = vld [vmem:[%s560_s3 + $0x8] sm:$0xff]  ;;  %v123_v12 = vld [vmem:[%s560_s3 + $0x10] sm:$0xff]  ;;  %v336_v15 = vpack.c.bf16 %v27_v9, %v26_v8 }
   0x4   :  { %331 = vmatpush3.bf16.msra.mxu0 %v330_v4  ;;  %v124_v13 = vld [vmem:[%s560_s3 + $0x18] sm:$0xff]  ;;  %v348_v14 = vpack.c.bf16 %v122_v11, %v121_v10  ;;  %v28_v16 = vld [vmem:[%s558_s1 + $0x30] sm:$0xff]  ;;  %v125_v19 = vld [vmem:[%s560_s3 + $0x20] sm:$0xff] }
   0x5   :  { %332 = vmatprep.subr.bf16.mxu0 %v399_v3  ;;  %v29_v17 = vld [vmem:[%s558_s1 + $0x38] sm:$0xff]  ;;  %v351_v18 = vpack.c.bf16 %v124_v13, %v123_v12  ;;  %v126_v20 = vld [vmem:[%s560_s3 + $0x28] sm:$0xff] }
   0x6   :  { %349 = vmatpush3.bf16.msra.mxu1 %v348_v14 }
   0x7   :  { %350 = vmatprep.subr.bf16.mxu1 %v399_v3 }
   0x8   :  { %334 = vmatpush3.bf16.msra.mxu0 %v333_v7 }
   0x9   :  { %335 = vmatprep.subr.bf16.mxu0 %v399_v3 }
   0xa   :  { %10 = vsyncpa [#allocation3], 0  ;;  %v339_v21 = vpack.c.bf16 %v29_v17, %v28_v16  ;;  %v30_v22 = vld [vmem:[%s558_s1 + $0x40] sm:$0xff]  ;;  %v31_v23 = vld [vmem:[%s558_s1 + $0x48] sm:$0xff]  ;;  %352 = vmatpush3.bf16.msra.mxu1 %v351_v18  ;;  %v354_v24 = vpack.c.bf16 %v126_v20, %v125_v19  ;;  %vm46_vm1 = vcmask 1043456   ;;  %vm42_vm2 = vcmask 818176  }
   0xb   :  { %353 = vmatprep.subr.bf16.mxu1 %v399_v3  ;;  %v127_v25 = vld [vmem:[%s560_s3 + $0x30] sm:$0xff]  ;;  %v128_v26 = vld [vmem:[%s560_s3 + $0x38] sm:$0xff]  ;;  %v342_v27 = vpack.c.bf16 %v31_v23, %v30_v22  ;;  %v129_v31 = vld [vmem:[%s560_s3 + $0x40] sm:$0xff]  ;;  %s402_s30 = smov [#allocation2]  }
   0xc   :  { %337 = vmatpush3.bf16.msra.mxu0 %v336_v15  ;;  %v32_v28 = vld [vmem:[%s558_s1 + $0x50] sm:$0xff]  ;;  %v33_v29 = vld [vmem:[%s558_s1 + $0x58] sm:$0xff]  ;;  %v357_v30 = vpack.c.bf16 %v128_v26, %v127_v25  ;;  %v130_v32 = vld [vmem:[%s560_s3 + $0x48] sm:$0xff]  ;;  %s222_s6 = sshll.u32 %s402_s30, 4  ;;  %s223_s6 = int_to_ptr.vmem [resolvable:$true] %s222_s6 }
   0xd   :  { %338 = vmatprep.subr.bf16.mxu0 %v399_v3  ;;  %v345_v33 = vpack.c.bf16 %v33_v29, %v32_v28  ;;  %v360_v34 = vpack.c.bf16 %v130_v32, %v129_v31  ;;  %v131_v35 = vld [vmem:[%s560_s3 + $0x50] sm:$0xff]  ;;  %v132_v36 = vld [vmem:[%s560_s3 + $0x58] sm:$0xff]  ;;  %v34_v37 = vld [vmem:[%s558_s1 + $0x60] sm:$0xf]  ;;  %p380_p1 = scmp.lt.s32.totalorder %s223_s6, %s223_s6 }
   0xe   :  { %355 = vmatpush3.bf16.msra.mxu1 %v354_v24  ;;  %v363_v38 = vpack.c.bf16 %v132_v36, %v131_v35  ;;  %v21_v39 = vld [vmem:[%s557_s0] sm:$0xff]  ;;  %v134_v41 = vld [vmem:[%s560_s3 + $0x68] sm:$0xff]  ;;  %v135_v43 = vld [vmem:[%s560_s3 + $0x70] sm:$0xff] }
   0xf   :  { %356 = vmatprep.subr.bf16.mxu1 %v399_v3  ;;  %v133_v40 = vld [vmem:[%s560_s3 + $0x60] sm:$0xff]  ;;  %v136_v44 = vld [vmem:[%s560_s3 + $0x78] sm:$0xff]  ;;  %s375_s3 = scalar_lea.vmem %s223_s6, 128 }
  0x10   :  { %340 = vmatpush3.bf16.msra.mxu0 %v339_v21  ;;  %v366_v42 = vpack.c.bf16 %v134_v41, %v133_v40  ;;  %v369_v45 = vpack.c.bf16 %v136_v44, %v135_v43  ;;  %v230_v46 = vld [vmem:[%s559_s2] ss:$0 sm:$0xff]  ;;  %p376_p0 = scmp.ne.s32.totalorder %s223_s6, %s375_s3  ;;  %p381_p2 = scmp.lt.s32.totalorder %s375_s3, %s375_s3 }
  0x11   :  { %341 = vmatprep.subr.bf16.mxu0 %v399_v3  ;;  %v233_v51 = vld [vmem:[%s561_s4] ss:$0 sm:$0xff] }
  0x12   :  { %358 = vmatpush3.bf16.msra.mxu1 %v357_v30  ;;  %p382_p3 = por %p381_p2, %p380_p1 }
  0x13   :  { %359 = vmatprep.subr.bf16.mxu1 %v399_v3 }
  0x14   :  { %343 = vmatpush3.bf16.msra.mxu0 %v342_v27  ;;  %p383_p4 = pnand %p382_p3, %p376_p0 }
  0x15   :  { %344 = vmatprep.subr.bf16.mxu0 %v399_v3 }
  0x16   :  { %361 = vmatpush3.bf16.msra.mxu1 %v360_v34 }
  0x17   :  { %362 = vmatprep.subr.bf16.mxu1 %v399_v3 }
  0x18   :  { %346 = vmatpush3.bf16.msra.mxu0 %v345_v33 }
  0x19   :  { %289 = vmatprep.subr.mxu0 %v401_v6 }
  0x1a   :  { %364 = vmatpush3.bf16.msra.mxu1 %v363_v38 }
  0x1b   :  { %365 = vmatprep.subr.bf16.mxu1 %v399_v3 }
  0x1c   :  { %290 = vmatpush3.msk.msra.mxu0 %vm46_vm1, %v34_v37 }
  0x1d   :  { %292 = vmatmul.mubr.msk.f32.vlgmr.msra.gmra.mrb[0].mxu0 %vm42_vm2, %v21_v39 }
  0x1e   :  { %367 = vmatpush3.bf16.msra.mxu1 %v366_v42 }
  0x1f   :  { %368 = vmatprep.subr.bf16.mxu1 %v399_v3 }
  0x22   :  { %370 = vmatpush3.bf16.msra.mxu1 %v369_v45 }
  0xf0   :  { %v116_v47 = vpop.f32.mrb[0].mxu0 }
  0xf1   :  { %v117_v48 = vadd.f32 %v230_v46, %v116_v47  ;;  %v293_v49 = vpop.f32.mrb[1].mxu0 }
  0xf3   :  { %v120_v50 = vmax.f32 %v117_v48, 0.0 }
  0xf5   :  { %327 = vmatmul.mubr.f32.vlgmr.msra.gmra.mrb[0].mxu1 %v120_v50 }
 0x1c8   :  { %v210_v52 = vpop.f32.mrb[0].mxu1 }
 0x1c9   :  { %v211_v53 = vadd.f32 %v233_v51, %v210_v52  ;;  %v328_v54 = vpop.f32.mrb[1].mxu1 }
 0x1cb   :  { %v214_v55 = vmax.f32 %v211_v53, 0.0 }
 0x1cd   :  { %215 = vst.msk [vmem:[#allocation2] sm:$0xff] %vm42_vm2, %v214_v55 }
 0x1ce   :  { %386 = shalt.err (!%p383_p4)
}
 0x1cf   :  { %s387_s4 = scalar_lea.hbm %s562_s5, 128 }
 0x1d0   :  { %p388_p5 = scmp.ne.s32.totalorder %s562_s5, %s387_s4  ;;  %p391_p6 = scmp.lt.u32.totalorder %s387_s4, %s562_s5 }
 0x1d2   :  { %p393_p7 = pnand %p391_p6, %p388_p5 }
 0x1d4   :  { %396 = shalt.err (!%p393_p7)
}
 0x1d5   :  { %225 = dma.vmem_to_hbm [thread:$0]  %s223_s6, 128, %s562_s5, [#allocation3]  }
 0x1d6   :  { %397 = dma.done.wait [#allocation3], 128  }
 0x1d7   :  { %398 = vsyncadd [#allocation3], 4294967168 }
 0x1d8   :  { %229 = vsyncpa [#allocation3], 1 }

</bundles_post_ra>
